<compile_context>
chip_gen: v7x
topology: tpu7x:2x2x1
jax: 0.10.0
libtpu: 0.0.40
codegen_flags: <defaults>
</compile_context>

<pallas_src>
import functools

import jax
import jax.numpy as jnp
import numpy as np
from jax.experimental import pallas as pl
from jax.experimental.pallas import tpu as pltpu

_EPS = 1e-5
_LANE = 128        # channel axes are zero-padded to a multiple of the lane width
_ROW_TILE = 256    # max flattened-row tile for the 1x1-conv (matmul) kernels


def _round_up(x, m):
    return (x + m - 1) // m * m


def _row_tile(total):
    return min(_ROW_TILE, _round_up(total, 8))


def _relu6(x):
    return jnp.minimum(jnp.maximum(x, 0.0), 6.0)


# --------------------------------------------------------------------------------------
# Kernel A: 1x1 expand conv as a lane-dense matmul + BN1 partial statistics.
# --------------------------------------------------------------------------------------
def _expand_kernel(x_ref, w_ref, y_ref, stats_ref):
    x = x_ref[...].astype(jnp.bfloat16)                               # (rt, Cin_p)
    y = jnp.dot(x, w_ref[...], preferred_element_type=jnp.float32)    # (rt, Pp) f32
    y_ref[...] = y
    p = y.shape[1]
    stats_ref[:, 0:1, :] = jnp.sum(y, axis=0).reshape(1, 1, p)
    stats_ref[:, 1:2, :] = jnp.sum(y * y, axis=0).reshape(1, 1, p)
    stats_ref[:, 2:8, :] = jnp.zeros((1, 6, p), jnp.float32)


# --------------------------------------------------------------------------------------
# Kernel B: (optional) BN1 + relu6, then 3x3 depthwise conv with stride/dilation,
#           one image per grid step, plus BN2 partial statistics.
# --------------------------------------------------------------------------------------
def _dw_kernel(y_ref, aff1_ref, w2_ref, d_ref, stats_ref, pad_ref, *,
               stride, dilation, apply_bn1):
    _, H, W, P = y_ref.shape
    _, Ho, Wo, _ = d_ref.shape
    pad = dilation
    Wp = W + 2 * pad

    h = y_ref[...]                                                    # (1, H, W, P) f32
    if apply_bn1:
        s1 = aff1_ref[0:1, :].reshape(1, 1, 1, P)
        b1 = aff1_ref[1:2, :].reshape(1, 1, 1, P)
        h = _relu6(h * s1 + b1)

    # Padded copy in VMEM scratch: zero only the halo border, then write the interior.
    pad_ref[:, 0:pad, :, :] = jnp.zeros((1, pad, Wp, P), jnp.float32)
    pad_ref[:, pad + H:pad + H + pad, :, :] = jnp.zeros((1, pad, Wp, P), jnp.float32)
    pad_ref[:, pad:pad + H, 0:pad, :] = jnp.zeros((1, H, pad, P), jnp.float32)
    pad_ref[:, pad:pad + H, pad + W:pad + W + pad, :] = jnp.zeros((1, H, pad, P), jnp.float32)
    pad_ref[:, pad:pad + H, pad:pad + W, :] = h

    w2 = w2_ref[...]                                                  # (16, P) f32 (rows 9..15 unused)
    wt = [w2[k:k + 1, :].reshape(1, 1, 1, P) for k in range(9)]       # hoisted tap broadcasts

    acc = jnp.zeros((1, Ho, Wo, P), jnp.float32)
    for dy in range(3):
        for dx in range(3):
            if stride == 1:
                tap = pad_ref[:, dy * dilation:dy * dilation + Ho,
                              dx * dilation:dx * dilation + Wo, :]
            else:
                # compute only at output positions (no full-res compute + post-slice)
                tap = pad_ref[:, pl.ds(dy * dilation, Ho, stride=stride),
                              pl.ds(dx * dilation, Wo, stride=stride), :]
            acc = acc + tap * wt[dy * 3 + dx]

    d_ref[...] = acc
    flat = acc.reshape(Ho * Wo, P)
    stats_ref[:, 0:1, :] = jnp.sum(flat, axis=0).reshape(1, 1, P)
    stats_ref[:, 1:2, :] = jnp.sum(flat * flat, axis=0).reshape(1, 1, P)
    stats_ref[:, 2:8, :] = jnp.zeros((1, 6, P), jnp.float32)


# --------------------------------------------------------------------------------------
# Kernel C: BN2 apply + relu6 + 1x1 project conv (matmul) + BN3 partial statistics.
# --------------------------------------------------------------------------------------
def _project_kernel(d_ref, aff2_ref, w3_ref, o_ref, stats_ref, *, n_valid, row_tile):
    d = d_ref[...]                                                    # (rt, Pp) f32
    h = _relu6(d * aff2_ref[0:1, :] + aff2_ref[1:2, :])
    o = jnp.dot(h.astype(jnp.bfloat16), w3_ref[...],
                preferred_element_type=jnp.float32)                   # (rt, Cout_p) f32
    # Zero rows that are pure padding of the flattened (N*Ho*Wo) axis so they do not
    # pollute the BN3 statistics (they are dropped by the wrapper anyway).
    rows = pl.program_id(0) * row_tile + jax.lax.broadcasted_iota(jnp.int32, (row_tile, 1), 0)
    o = jnp.where(rows < n_valid, o, 0.0)
    o_ref[...] = o
    c = o.shape[1]
    stats_ref[:, 0:1, :] = jnp.sum(o, axis=0).reshape(1, 1, c)
    stats_ref[:, 1:2, :] = jnp.sum(o * o, axis=0).reshape(1, 1, c)
    stats_ref[:, 2:8, :] = jnp.zeros((1, 6, c), jnp.float32)


# --------------------------------------------------------------------------------------
# Kernel D: BN3 apply + optional identity shortcut (re-reads the original input here).
# --------------------------------------------------------------------------------------
def _bn3_kernel(o_ref, aff3_ref, *rest, shortcut):
    out_ref = rest[-1]
    o = o_ref[...] * aff3_ref[0:1, :] + aff3_ref[1:2, :]
    if shortcut:
        o = o + rest[0][...]
    out_ref[...] = o.astype(out_ref.dtype)


# --------------------------------------------------------------------------------------
# JAX glue: fold per-tile (sum, sumsq) partials into per-channel BN scale/shift rows.
# --------------------------------------------------------------------------------------
def _bn_affine(stats, count, gamma_p, beta_p):
    s = stats[:, 0, :].sum(axis=0)
    ss = stats[:, 1, :].sum(axis=0)
    mean = s / count
    var = jnp.maximum(ss / count - mean * mean, 0.0)
    scale = gamma_p * jax.lax.rsqrt(var + _EPS)
    shift = beta_p - mean * scale
    aff = jnp.zeros((8, gamma_p.shape[0]), jnp.float32)
    return aff.at[0].set(scale).at[1].set(shift)


# --------------------------------------------------------------------------------------
# Wrapper: NCHW in / NCHW out.
# --------------------------------------------------------------------------------------
def block_forward(x_nchw, params, *, in_planes, out_planes, expansion, stride, current_rate=1):
    shortcut = (stride == 1 and in_planes == out_planes)
    dilation = current_rate
    pad = dilation

    x = jnp.transpose(x_nchw, (0, 2, 3, 1)).astype(jnp.float32)       # NCHW -> NHWC
    N, H, W, Cin = x.shape
    P = expansion * in_planes if expansion > 1 else in_planes
    Cin_p = _round_up(Cin, _LANE)
    Pp = _round_up(P, _LANE)
    Cout_p = _round_up(out_planes, _LANE)
    Ho = (H + 2 * pad - 2 * dilation - 1) // stride + 1
    Wo = (W + 2 * pad - 2 * dilation - 1) // stride + 1

    cp = pltpu.CompilerParams(dimension_semantics=("parallel",),
                              vmem_limit_bytes=64 * 1024 * 1024)

    # ---- lane-padded parameters --------------------------------------------------------
    w2_p = jnp.zeros((16, Pp), jnp.float32).at[:9, :P].set(params["w2"])
    g2_p = jnp.zeros((Pp,), jnp.float32).at[:P].set(params["g2"])
    b2_p = jnp.zeros((Pp,), jnp.float32).at[:P].set(params["b2"])
    w3_p = jnp.zeros((Pp, Cout_p), jnp.bfloat16).at[:P, :out_planes].set(
        params["w3"].astype(jnp.bfloat16))
    g3_p = jnp.zeros((Cout_p,), jnp.float32).at[:out_planes].set(params["g3"])
    b3_p = jnp.zeros((Cout_p,), jnp.float32).at[:out_planes].set(params["b3"])

    # flattened, lane- and row-padded input (rows = N*H*W); padded rows/channels are zero
    rows_a = N * H * W
    rt_a = _row_tile(rows_a)
    rows_a_p = _round_up(rows_a, rt_a)
    x_flat = jnp.zeros((rows_a_p, Cin_p), jnp.float32).at[:rows_a, :Cin].set(
        x.reshape(rows_a, Cin))

    # ---- A: expand 1x1 conv + BN1 stats ------------------------------------------------
    if expansion > 1:
        w1_p = jnp.zeros((Cin_p, Pp), jnp.bfloat16).at[:Cin, :P].set(
            params["w1"].astype(jnp.bfloat16))
        g1_p = jnp.zeros((Pp,), jnp.float32).at[:P].set(params["g1"])
        b1_p = jnp.zeros((Pp,), jnp.float32).at[:P].set(params["b1"])
        ga = rows_a_p // rt_a
        y_flat, stats1 = pl.pallas_call(
            _expand_kernel,
            grid=(ga,),
            in_specs=[pl.BlockSpec((rt_a, Cin_p), lambda i: (i, 0)),
                      pl.BlockSpec((Cin_p, Pp), lambda i: (0, 0))],
            out_specs=[pl.BlockSpec((rt_a, Pp), lambda i: (i, 0)),
                       pl.BlockSpec((1, 8, Pp), lambda i: (i, 0, 0))],
            out_shape=[jax.ShapeDtypeStruct((rows_a_p, Pp), jnp.float32),
                       jax.ShapeDtypeStruct((ga, 8, Pp), jnp.float32)],
            compiler_params=cp,
        )(x_flat, w1_p)
        aff1 = _bn_affine(stats1, rows_a, g1_p, b1_p)
        y_img = y_flat[:rows_a].reshape(N, H, W, Pp)
        apply_bn1 = True
    else:
        y_img = jnp.zeros((N, H, W, Pp), jnp.float32).at[:, :, :, :Cin].set(x)
        aff1 = jnp.zeros((8, Pp), jnp.float32)     # unused (apply_bn1=False)
        apply_bn1 = False

    # ---- B: depthwise 3x3 conv (per image) + BN2 stats ---------------------------------
    dw = functools.partial(_dw_kernel, stride=stride, dilation=dilation, apply_bn1=apply_bn1)
    d_img, stats2 = pl.pallas_call(
        dw,
        grid=(N,),
        in_specs=[pl.BlockSpec((1, H, W, Pp), lambda n: (n, 0, 0, 0)),
                  pl.BlockSpec((8, Pp), lambda n: (0, 0)),
                  pl.BlockSpec((16, Pp), lambda n: (0, 0))],
        out_specs=[pl.BlockSpec((1, Ho, Wo, Pp), lambda n: (n, 0, 0, 0)),
                   pl.BlockSpec((1, 8, Pp), lambda n: (n, 0, 0))],
        out_shape=[jax.ShapeDtypeStruct((N, Ho, Wo, Pp), jnp.float32),
                   jax.ShapeDtypeStruct((N, 8, Pp), jnp.float32)],
        scratch_shapes=[pltpu.VMEM((1, H + 2 * pad, W + 2 * pad, Pp), jnp.float32)],
        compiler_params=cp,
    )(y_img, aff1, w2_p)
    aff2 = _bn_affine(stats2, N * Ho * Wo, g2_p, b2_p)

    # ---- C: project 1x1 conv + BN3 stats -----------------------------------------------
    rows_c = N * Ho * Wo
    rt_c = _row_tile(rows_c)
    rows_c_p = _round_up(rows_c, rt_c)
    gc = rows_c_p // rt_c
    d_flat = jnp.zeros((rows_c_p, Pp), jnp.float32).at[:rows_c].set(
        d_img.reshape(rows_c, Pp))
    proj = functools.partial(_project_kernel, n_valid=rows_c, row_tile=rt_c)
    o_flat, stats3 = pl.pallas_call(
        proj,
        grid=(gc,),
        in_specs=[pl.BlockSpec((rt_c, Pp), lambda i: (i, 0)),
                  pl.BlockSpec((8, Pp), lambda i: (0, 0)),
                  pl.BlockSpec((Pp, Cout_p), lambda i: (0, 0))],
        out_specs=[pl.BlockSpec((rt_c, Cout_p), lambda i: (i, 0)),
                   pl.BlockSpec((1, 8, Cout_p), lambda i: (i, 0, 0))],
        out_shape=[jax.ShapeDtypeStruct((rows_c_p, Cout_p), jnp.float32),
                   jax.ShapeDtypeStruct((gc, 8, Cout_p), jnp.float32)],
        compiler_params=cp,
    )(d_flat, aff2, w3_p)
    aff3 = _bn_affine(stats3, rows_c, g3_p, b3_p)

    # ---- D: BN3 apply + identity shortcut ----------------------------------------------
    bn3 = functools.partial(_bn3_kernel, shortcut=shortcut)
    in_specs = [pl.BlockSpec((rt_c, Cout_p), lambda i: (i, 0)),
                pl.BlockSpec((8, Cout_p), lambda i: (0, 0))]
    args = [o_flat, aff3]
    if shortcut:
        # shortcut implies Cin_p == Cout_p and rows_a_p == rows_c_p, so x_flat is reusable
        in_specs.append(pl.BlockSpec((rt_c, Cout_p), lambda i: (i, 0)))
        args.append(x_flat)
    out_flat = pl.pallas_call(
        bn3,
        grid=(gc,),
        in_specs=in_specs,
        out_specs=pl.BlockSpec((rt_c, Cout_p), lambda i: (i, 0)),
        out_shape=jax.ShapeDtypeStruct((rows_c_p, Cout_p), x_nchw.dtype),
        compiler_params=cp,
    )(*args)

    out = out_flat[:rows_c, :out_planes].reshape(N, Ho, Wo, out_planes)
    return jnp.transpose(out, (0, 3, 1, 2))                           # NHWC -> NCHW


# --------------------------------------------------------------------------------------
# Deterministic synthetic parameters (shapes match the nn.Module's __init__).
# --------------------------------------------------------------------------------------
def init_params(key, in_planes, out_planes, expansion):
    P = expansion * in_planes if expansion > 1 else in_planes
    k1, k2, k3 = jax.random.split(key, 3)
    params = {
        # conv2: 3x3 depthwise; taps flattened row-major (dy, dx) -> (9, P)
        "w2": jax.random.normal(k2, (9, P), jnp.float32) * 0.3,
        "g2": 1.0 - 0.02 * jnp.arange(P, dtype=jnp.float32),
        "b2": -0.03 * jnp.arange(P, dtype=jnp.float32),
        # conv3: 1x1, (P -> Cout); stored as (P, Cout)
        "w3": jax.random.normal(k3, (P, out_planes), jnp.float32) * 0.3,
        "g3": 1.0 + 0.05 * jnp.arange(out_planes, dtype=jnp.float32),
        "b3": 0.02 * jnp.arange(out_planes, dtype=jnp.float32),
    }
    if expansion > 1:
        # conv1: 1x1, (Cin -> P); stored as (Cin, P) for NHWC matmul
        params["w1"] = jax.random.normal(k1, (in_planes, P), jnp.float32) * 0.3
        params["g1"] = 1.0 + 0.10 * jnp.arange(P, dtype=jnp.float32)
        params["b1"] = 0.05 * jnp.arange(P, dtype=jnp.float32)
    return params


# --------------------------------------------------------------------------------------
# Pure-JAX reference (same math; matmuls use bf16 MXU inputs like the kernel).
# --------------------------------------------------------------------------------------
def block_reference(x_nchw, params, *, in_planes, out_planes, expansion, stride, current_rate=1):
    shortcut = (stride == 1 and in_planes == out_planes)
    dilation = current_rate
    pad = dilation
    x = jnp.transpose(x_nchw, (0, 2, 3, 1)).astype(jnp.float32)

    def bn(y, g, b):
        mean = y.mean(axis=(0, 1, 2), keepdims=True)
        var = ((y - mean) ** 2).mean(axis=(0, 1, 2), keepdims=True)
        return (y - mean) / jnp.sqrt(var + _EPS) * g.reshape(1, 1, 1, -1) + b.reshape(1, 1, 1, -1)

    relu6 = lambda y: jnp.clip(y, 0.0, 6.0)

    if expansion > 1:
        y = jnp.einsum("nhwc,cp->nhwp", x.astype(jnp.bfloat16),
                       params["w1"].astype(jnp.bfloat16),
                       preferred_element_type=jnp.float32)
        h = relu6(bn(y, params["g1"], params["b1"]))
    else:
        h = x
    H, W = h.shape[1], h.shape[2]
    hp = jnp.pad(h, ((0, 0), (pad, pad), (pad, pad), (0, 0)))
    acc = jnp.zeros_like(h)
    for dy in range(3):
        for dx in range(3):
            acc = acc + hp[:, dy * dilation:dy * dilation + H,
                           dx * dilation:dx * dilation + W, :] * params["w2"][dy * 3 + dx]
    acc = acc[:, ::stride, ::stride, :]
    d = relu6(bn(acc, params["g2"], params["b2"]))
    o = jnp.einsum("nhwp,pk->nhwk", d.astype(jnp.bfloat16),
                   params["w3"].astype(jnp.bfloat16),
                   preferred_element_type=jnp.float32)
    o = bn(o, params["g3"], params["b3"])
    if shortcut:
        o = o + x
    return jnp.transpose(o, (0, 3, 1, 2))


if __name__ == "__main__":
    key = jax.random.PRNGKey(0)

    configs = [
        # (in_planes, out_planes, expansion, stride, current_rate, N, H, W)
        (4, 4, 6, 1, 1, 2, 16, 16),     # expand path + identity shortcut
        (8, 16, 1, 1, 2, 2, 16, 16),    # no-expand path, dilation=2, no shortcut
    ]
    for cin, cout, exp, s, rate, n, hh, ww in configs:
        kx, kp, key = jax.random.split(key, 3)
        x = jax.random.normal(kx, (n, cin, hh, ww), jnp.float32)      # NCHW, like PyTorch
        params = init_params(kp, cin, cout, exp)

        out = block_forward(x, params, in_planes=cin, out_planes=cout,
                            expansion=exp, stride=s, current_rate=rate)
        out = jax.block_until_ready(out)

        ref = block_reference(x, params, in_planes=cin, out_planes=cout,
                              expansion=exp, stride=s, current_rate=rate)
        np.testing.assert_allclose(np.asarray(out), np.asarray(ref), rtol=1e-2, atol=1e-2)

    print("KERNEL_OK")
</pallas_src>

<mosaic_0001>
module attributes {stable_mosaic.version = 11 : i64} {
  func.func @_expand_kernel(%arg0: i32, %arg1: memref<256x128xf32, #tpu.memory_space<vmem>>, %arg2: memref<128x128xbf16, #tpu.memory_space<vmem>>, %arg3: memref<256x128xf32, #tpu.memory_space<vmem>>, %arg4: memref<1x8x128xf32, #tpu.memory_space<vmem>>) attributes {dimension_semantics = [#tpu.dimension_semantics<parallel>], iteration_bounds = array<i64: 2>, scalar_prefetch = 0 : i64, scratch_operands = 0 : i64, tpu.core_type = #tpu.core_type<tc>, window_params = [{transform_indices = @transform_0, window_bounds = array<i64: 256, 128>}, {pipeline_mode = #tpu.pipeline_mode<synchronous>, transform_indices = @transform_1, window_bounds = array<i64: 128, 128>}, {transform_indices = @transform_2, window_bounds = array<i64: 256, 128>}, {transform_indices = @transform_3, window_bounds = array<i64: 1, 8, 128>}]} {
    %c0 = arith.constant 0 : index
    %c0_0 = arith.constant 0 : index
    %0 = vector.load %arg1[%c0, %c0_0] : memref<256x128xf32, #tpu.memory_space<vmem>>, vector<256x128xf32>
    %1 = arith.truncf %0 : vector<256x128xf32> to vector<256x128xbf16>
    %c0_1 = arith.constant 0 : index
    %c0_2 = arith.constant 0 : index
    %2 = vector.load %arg2[%c0_1, %c0_2] : memref<128x128xbf16, #tpu.memory_space<vmem>>, vector<128x128xbf16>
    %cst = arith.constant dense<0.000000e+00> : vector<256x128xf32>
    %3 = tpu.matmul %1, %2, %cst {dimension_numbers = #tpu.dot_dimension_numbers<[1], [0], [0], [1], [0, 0, 1, 1], [], []>} : vector<256x128xbf16>, vector<128x128xbf16>, vector<256x128xf32> -> vector<256x128xf32>
    %c0_3 = arith.constant 0 : index
    %c0_4 = arith.constant 0 : index
    %4 = vector.load %arg3[%c0_3, %c0_4] : memref<256x128xf32, #tpu.memory_space<vmem>>, vector<256x128xf32>
    tpu.vector_store %arg3[%c0_3, %c0_4], %3 {strides = array<i32>} : memref<256x128xf32, #tpu.memory_space<vmem>>, vector<256x128xf32>,
    %cst_5 = arith.constant dense<0.000000e+00> : vector<128xf32>
    %5 = vector.multi_reduction <add>, %3, %cst_5 [0] : vector<256x128xf32> to vector<128xf32>
    %6 = vector.shape_cast %5 : vector<128xf32> to vector<1x1x128xf32>
    %c0_6 = arith.constant 0 : index
    %c0_7 = arith.constant 0 : index
    %c0_8 = arith.constant 0 : index
    %7 = vector.load %arg4[%c0_6, %c0_7, %c0_8] : memref<1x8x128xf32, #tpu.memory_space<vmem>>, vector<1x1x128xf32>
    tpu.vector_store %arg4[%c0_6, %c0_7, %c0_8], %6 {strides = array<i32>} : memref<1x8x128xf32, #tpu.memory_space<vmem>>, vector<1x1x128xf32>,
    %8 = arith.mulf %3, %3 : vector<256x128xf32>
    %cst_9 = arith.constant dense<0.000000e+00> : vector<128xf32>
    %9 = vector.multi_reduction <add>, %8, %cst_9 [0] : vector<256x128xf32> to vector<128xf32>
    %10 = vector.shape_cast %9 : vector<128xf32> to vector<1x1x128xf32>
    %c0_10 = arith.constant 0 : index
    %c1 = arith.constant 1 : index
    %c0_11 = arith.constant 0 : index
    %11 = vector.load %arg4[%c0_10, %c1, %c0_11] : memref<1x8x128xf32, #tpu.memory_space<vmem>>, vector<1x1x128xf32>
    tpu.vector_store %arg4[%c0_10, %c1, %c0_11], %10 {strides = array<i32>} : memref<1x8x128xf32, #tpu.memory_space<vmem>>, vector<1x1x128xf32>,
    %cst_12 = arith.constant 0.000000e+00 : f32
    %12 = vector.broadcast %cst_12 : f32 to vector<1x6x128xf32>
    %c0_13 = arith.constant 0 : index
    %c2 = arith.constant 2 : index
    %c0_14 = arith.constant 0 : index
    %13 = vector.load %arg4[%c0_13, %c2, %c0_14] : memref<1x8x128xf32, #tpu.memory_space<vmem>>, vector<1x6x128xf32>
    tpu.vector_store %arg4[%c0_13, %c2, %c0_14], %12 {strides = array<i32>} : memref<1x8x128xf32, #tpu.memory_space<vmem>>, vector<1x6x128xf32>,
    return
  }
  func.func @transform_0(%arg0: i32) -> (i32, i32) {
    %c0_i32 = arith.constant 0 : i32
    %c0_i32_0 = arith.constant 0 : i32
    return %arg0, %c0_i32 : i32, i32
  }
  func.func @transform_1(%arg0: i32) -> (i32, i32) {
    %c0_i32 = arith.constant 0 : i32
    %c0_i32_0 = arith.constant 0 : i32
    %c0_i32_1 = arith.constant 0 : i32
    return %c0_i32, %c0_i32_0 : i32, i32
  }
  func.func @transform_2(%arg0: i32) -> (i32, i32) {
    %c0_i32 = arith.constant 0 : i32
    %c0_i32_0 = arith.constant 0 : i32
    return %arg0, %c0_i32 : i32, i32
  }
  func.func @transform_3(%arg0: i32) -> (i32, i32, i32) {
    %c0_i32 = arith.constant 0 : i32
    %c0_i32_0 = arith.constant 0 : i32
    %c0_i32_1 = arith.constant 0 : i32
    return %arg0, %c0_i32, %c0_i32_0 : i32, i32, i32
  }
}

</mosaic_0001>

<bundles_post_ra>
// kernel: tpu_custom_call.1
= control target key start
LH: loop header
LB: loop body
LE: loop exit
PB: predicated region body
PF: predicated region fallthrough
CT: control target
= control target key end

     0   :  { %9 = vsyncpa [#allocation3], 0  ;;  %s1573_s0 = inlined_call_operand.hbm [shape: f32[512,128], index: 0, kind: input, shape index: {}]   ;;  %s1574_s1 = inlined_call_operand.hbm [shape: bf16[128,128], index: 1, kind: input, shape index: {}]   ;;  %s1575_s2 = inlined_call_operand.hbm [shape: f32[512,128], index: 2, kind: output, shape index: {0}]   ;;  %s1576_s3 = inlined_call_operand.hbm [shape: f32[2,8,128], index: 3, kind: output, shape index: {1}]  }
   0x1   :  { %11 = vsyncpa [#allocation3 + $0x1], 0 }
   0x2   :  { %12 = vsyncpa [#allocation6], 0 }
   0x3   :  { %13 = vsyncpa [#allocation4], 0 }
   0x4   :  { %15 = vsyncpa [#allocation4 + $0x1], 0 }
   0x5   :  { %16 = vsyncpa [#allocation9], 0 }
   0x6   :  { %18 = vsyncpa [#allocation9 + $0x1], 0  ;;  %s1166_s12 = smov 0   ;;  %s1168_s13 = smov 0  }
   0x7   :  { %s1170_s14 = smov 0   ;;  %s1172_s15 = smov 0  }
   0x8 LB: > { %s1187_s16 = sadd.s32 4294967295, %s1133_s15   ;;  %s779_s17 = sadd.s32 4294967294, %s1133_s15   ;;  %s1133_s15 = sphi %s1172_s15, %s1596_s15   ;;  %s1129_s14 = sphi %s1170_s14, %s1595_s14   ;;  %s1125_s13 = sphi %s1168_s13, %s1594_s13   ;;  %s1121_s12 = sphi %s1166_s12, %s1593_s12  }
   0x9   : > { %p44_p0 = scmp.ne.s32.totalorder %s1125_s13, %s1121_s12  ;;  %p1577_p1 = scmp.eq.s32.totalorder %s1187_s16, 0 }
   0xa   : > { %p95_p3 = scmp.eq.s32.totalorder %s779_s17, 1  ;;  %p780_p5 = scmp.ge.s32.totalorder %s1133_s15, 1 }
   0xb   : > { %p1196_p4 = por %p1577_p1, %p44_p0  ;;  %p128_p7 = scmp.lt.s32.totalorder %s1133_s15, 3 }
   0xc   : > { %p1201_p6 = por %p95_p3, %p44_p0  ;;  %s1135_s21 = smov [#allocation5]  }
   0xd   : > { %s1580_s18 = scalar_select %p1196_p4, 1, 0 }
   0xe   : > { %s1581_s19 = scalar_select %p1201_p6, 1, 0 }
   0xf   : > { %p1206_p8 = pnand %p780_p5, %p128_p7  ;;  %s140_s22 = sshll.u32 %s1135_s21, 4  ;;  %s1210_s22 = int_to_ptr.vmem [resolvable:$true] %s140_s22 }
  0x10   : > { %s1222_s24 = sadd.s32 1, %s1133_s15   ;;  %s31_s25 = sadd.s32 1, %s1129_s14 }
  0x11   : > { %s1582_s20 = scalar_select %p1206_p8, 1, 0 }
  0x12   : > { %p906_p9 = pneg %p1206_p8  ;;  %s28_s26 = ssub.s32 %s1133_s15, %s1222_s24 }
  0x13   : > { %s973_s29 = scalar_lea.hbm %s1574_s1, 1024 }
  0x14   : > { %p1217_p11 = pnand %p906_p9, %p1577_p1  ;;  %p974_p12 = scmp.ne.s32.totalorder %s1574_s1, %s973_s29 }
  0x15   : > { %p980_p5 = scmp.lt.u32.totalorder %s973_s29, %s1574_s1 }
  0x16   : > { %p975_p13 = pneg %p1217_p11 }
  0x18   : > { %p976_p0 = pnand %p975_p13, %p974_p12 }
  0x1a   : > { %p977_p3 = pneg %p976_p0 }
  0x1c   : > { %p982_p7 = pnand %p980_p5, %p977_p3 }
  0x1e   : > { %985 = shalt.err (!%p982_p7)
}
  0x1f   : > { %s986_s7 = scalar_lea.vmem %s1210_s22, 1024  ;;  %p994_p2 = scmp.lt.s32.totalorder %s1210_s22, %s1210_s22 }
  0x20   : > { %p987_p9 = scmp.ne.s32.totalorder %s1210_s22, %s986_s7  ;;  %p995_p6 = scmp.lt.s32.totalorder %s986_s7, %s986_s7 }
  0x22   : > { %p989_p10 = pnand %p987_p9, %p975_p13  ;;  %p996_p4 = por %p995_p6, %p994_p2 }
  0x24   : > { %p990_p1 = pneg %p989_p10 }
  0x26   : > { %p997_p8 = pnand %p996_p4, %p990_p1 }
  0x28   : > { %1000 = shalt.err (!%p997_p8)
}
  0x29   : > { %s1136_s8 = smov 64   ;;  %s1137_s9 = smov 4  }
  0x2a   : > { %909 = dma.hbm_to_vmem [thread:$0]  (!%p1217_p11), %s1574_s1, 1024, %s1210_s22, [#allocation6], %s1136_s8, %s1136_s8, %s1137_s9  }
  0x2b   : > { %p29_p2 = scmp.eq.s32.totalorder %s28_s26, 0  ;;  %p38_p1 = scmp.ne.s32.totalorder %s1129_s14, %s1125_s13 }
  0x2c   : > { %p39_p4 = scmp.eq.s32.totalorder %s1133_s15, 0  ;;  %p922_p6 = scmp.lt.s32.totalorder %s1133_s15, 2 }
  0x2d   : > { %s1253_s17 = scalar_select %p29_p2, %s1129_s14, %s31_s25  }
  0x2e   : > { %p40_p8 = por %p39_p4, %p38_p1  ;;  %p1584_p10 = scmp.eq.s32.totalorder %s1187_s16, 1 }
  0x2f   : > { %s154_s27 = sand.u32 1, %s1129_s14   ;;  %s806_s28 = sshll.u32 %s1133_s15, 12 }
  0x30   : > { %p1257_p12 = por %p1584_p10, %p38_p1  ;;  %s783_s29 = sshll.u32 %s154_s27, 8 }
  0x31   : > { %s1266_s4 = scalar_lea.hbm %s1573_s0, %s806_s28  ;;  %s158_s22 = scalar_lea.vmem [#allocation2], %s783_s29 }
  0x32   : > { %s165_s25 = sshll.u32 %s158_s22, 4  ;;  %p1268_p11 = pnand %p922_p6, %p40_p8  ;;  %s1272_s25 = int_to_ptr.vmem [resolvable:$true] %s165_s25 }
  0x33   : > { %s1274_s5 = scalar_lea.sflag [#allocation3], %s154_s27  ;;  %s1001_s6 = scalar_lea.hbm %s1266_s4, 4096 }
  0x34   : > { %p1002_p13 = scmp.ne.s32.totalorder %s1266_s4, %s1001_s6  ;;  %p1003_p0 = pneg %p1268_p11 }
  0x35   : > { %s1006_s9 = scalar_lea.hbm %s1573_s0, 8192  ;;  %p1007_p7 = scmp.lt.u32.totalorder %s1266_s4, %s1573_s0 }
  0x36   : > { %p1004_p3 = pnand %p1003_p0, %p1002_p13  ;;  %p1008_p9 = scmp.lt.u32.totalorder %s1006_s9, %s1001_s6 }
  0x37   : > { %p1010_p1 = scmp.lt.u32.totalorder %s1001_s6, %s1266_s4 }
  0x38   : > { %p1005_p5 = pneg %p1004_p3  ;;  %p1009_p2 = por %p1008_p9, %p1007_p7 }
  0x3a   : > { %p1011_p4 = por %p1010_p1, %p1009_p2 }
  0x3c   : > { %p1012_p6 = pnand %p1011_p4, %p1005_p5 }
  0x3e   : > { %1015 = shalt.err (!%p1012_p6)
}
  0x3f   : > { %s1016_s27 = scalar_lea.vmem %s1272_s25, 4096  ;;  %s1138_s28 = smov [#allocation2]  }
  0x40   : > { %p1017_p8 = scmp.ne.s32.totalorder %s1272_s25, %s1016_s27  ;;  %s1021_s29 = sshll.u32 %s1138_s28, 4  ;;  %s1022_s29 = int_to_ptr.vmem [resolvable:$false] %s1021_s29 }
  0x41   : > { %s1023_s23 = scalar_lea.vmem %s1022_s29, 8192  ;;  %p1024_p3 = scmp.lt.s32.totalorder %s1272_s25, %s1022_s29 }
  0x42   : > { %p1019_p10 = pnand %p1017_p8, %p1003_p0  ;;  %p1025_p7 = scmp.lt.s32.totalorder %s1023_s23, %s1016_s27 }
  0x44   : > { %p1020_p13 = pneg %p1019_p10  ;;  %p1026_p9 = por %p1025_p7, %p1024_p3 }
  0x46   : > { %p1027_p2 = pnand %p1026_p9, %p1020_p13 }
  0x48   : > { %1030 = shalt.err (!%p1027_p2)
}
  0x49   : > { %s1139_s30 = smov 128   ;;  %s1140_s22 = smov 8  }
  0x4a   : > { %913 = dma.hbm_to_vmem [thread:$0]  (!%p1268_p11), %s1266_s4, 4096, %s1272_s25, %s1274_s5, %s1139_s30, %s1139_s30, %s1140_s22  }
  0x4b   : > { %p1587_p0 = scmp.ne.s32.totalorder %s1582_s20, 0 }
  0x4c   : > { %s1305_s6 = sand.u32 (!%p1587_p0), 1, %s1125_s13   ;;  %p1588_p5 = scmp.ne.s32.totalorder (!%p1587_p0), %s1580_s18, 0 }
  0x4d   : > { %177 = sbr.rel (%p1587_p0) target bundleno = 437 (0x1b5), region = 28  ;;  %s787_s7 = sshll.u32 (!%p1587_p0), %s1305_s6, 8 }
  0x4e   : > { %s180_s8 = scalar_lea.sflag (!%p1587_p0), [#allocation3], %s1305_s6  ;;  %s1311_s9 = scalar_lea.vmem (!%p1587_p0), [#allocation2], %s787_s7 }
  0x54   : > { %1104 = dma.done.wait (%p1588_p5), %s180_s8, 4096  }
  0x55   : > { %1106 = vsyncadd (%p1588_p5), %s180_s8, 4294963200  ;;  %p1589_p11 = scmp.eq.s32.totalorder %s1187_s16, 0 }
  0x57   : > { %1108 = dma.done.wait (%p1589_p11), [#allocation6], 1024   ;;  %p1590_p1 = pmov %p1589_p11 }
  0x58   : > { %v965_v0 = vld [vmem:[#allocation5] sm:$0xff]   ;;  %v966_v1 = vld [vmem:[#allocation5 + $0x8] sm:$0xff]   ;;  %v967_v2 = vld [vmem:[#allocation5 + $0x10] sm:$0xff]   ;;  %s790_s18 = sshll.u32 %s1305_s6, 3  ;;  %v1141_v56 = vmov 0.0   ;;  %s1359_s4 = scalar_lea.vmem [#allocation7], %s787_s7 }
  0x59   : > { %1110 = vsyncadd (%p1590_p1), [#allocation6], 4294966272  ;;  %832 = vmatprep.subr.bf16.mxu0 %v965_v0  ;;  %880 = vmatprep.subr.bf16.mxu1 %v965_v0  ;;  %v968_v3 = vld [vmem:[#allocation5 + $0x18] sm:$0xff]   ;;  %v218_v4 = vld [vmem:[%s1311_s9] sm:$0xff]  ;;  %s1354_s20 = scalar_lea.vmem [#allocation8], %s790_s18  ;;  %s807_s25 = sshll.u32 %s1187_s16, 12 }
  0x5a   : > { %833 = vmatpush3.bf16.msra.mxu0 %v965_v0  ;;  %888 = vmatpush3.bf16.msra.mxu1 %v965_v0  ;;  %v219_v5 = vld [vmem:[%s1311_s9 + $0x8] sm:$0xff]  ;;  %v969_v7 = vld [vmem:[#allocation5 + $0x20] sm:$0xff]   ;;  %v971_v12 = vld [vmem:[#allocation5 + $0x30] sm:$0xff]   ;;  %631 = vst [vmem:[%s1354_s20 + $0x2] sm:$0x3f] %v1141_v56  ;;  %s651_s26 = sshll.u32 %s1359_s4, 4  ;;  %s1434_s11 = scalar_lea.hbm %s1575_s2, %s807_s25  ;;  %s1436_s26 = int_to_ptr.vmem [resolvable:$true] %s651_s26 }
  0x5b   : > { %834 = vmatprep.subr.bf16.mxu0 %v966_v1  ;;  %881 = vmatprep.subr.bf16.mxu1 %v966_v1  ;;  %v250_v6 = vpack.c.bf16 %v219_v5, %v218_v4  ;;  %v234_v8 = vld [vmem:[%s1311_s9 + $0x80] sm:$0xff]  ;;  %v235_v9 = vld [vmem:[%s1311_s9 + $0x88] sm:$0xff]  ;;  %v972_v13 = vld [vmem:[#allocation5 + $0x38] sm:$0xff]   ;;  %s633_s27 = scalar_lea.sflag [#allocation4], %s1305_s6  ;;  %s1031_s28 = scalar_lea.vmem %s1436_s26, 4096 }
  0x5c   : > { %v258_v10 = vpack.c.bf16 %v235_v9, %v234_v8  ;;  %v970_v11 = vld [vmem:[#allocation5 + $0x28] sm:$0xff]   ;;  %v220_v14 = vld [vmem:[%s1311_s9 + $0x10] sm:$0xff]  ;;  %v221_v15 = vld [vmem:[%s1311_s9 + $0x18] sm:$0xff]  ;;  %p1032_p4 = scmp.ne.s32.totalorder %s1436_s26, %s1031_s28  ;;  %s1142_s29 = smov [#allocation7]  }
  0x5d   : > { %848 = vmatprep.mubr.bf16.mxu0 %v250_v6  ;;  %v222_v16 = vld [vmem:[%s1311_s9 + $0x20] sm:$0xff]  ;;  %v223_v17 = vld [vmem:[%s1311_s9 + $0x28] sm:$0xff]  ;;  %v236_v18 = vld [vmem:[%s1311_s9 + $0x90] sm:$0xff]  ;;  %v251_v22 = vpack.c.bf16 %v221_v15, %v220_v14  ;;  %s1035_s23 = sshll.u32 %s1142_s29, 4  ;;  %s1036_s23 = int_to_ptr.vmem [resolvable:$false] %s1035_s23 }
  0x5e   : > { %835 = vmatpush3.bf16.msra.mxu0 %v966_v1  ;;  %889 = vmatpush3.bf16.msra.mxu1 %v966_v1  ;;  %v237_v19 = vld [vmem:[%s1311_s9 + $0x98] sm:$0xff]  ;;  %v238_v20 = vld [vmem:[%s1311_s9 + $0xa0] sm:$0xff]  ;;  %v239_v21 = vld [vmem:[%s1311_s9 + $0xa8] sm:$0xff]  ;;  %v252_v23 = vpack.c.bf16 %v223_v17, %v222_v16  ;;  %p1033_p6 = pnand %p1032_p4, %p1257_p12  ;;  %s1037_s30 = scalar_lea.vmem %s1036_s23, 8192 }
  0x5f   : > { %836 = vmatprep.subr.bf16.mxu0 %v967_v2  ;;  %882 = vmatprep.subr.bf16.mxu1 %v967_v2  ;;  %v259_v24 = vpack.c.bf16 %v237_v19, %v236_v18  ;;  %v260_v25 = vpack.c.bf16 %v239_v21, %v238_v20  ;;  %v224_v26 = vld [vmem:[%s1311_s9 + $0x30] sm:$0xff]  ;;  %v225_v27 = vld [vmem:[%s1311_s9 + $0x38] sm:$0xff]  ;;  %v226_v28 = vld [vmem:[%s1311_s9 + $0x40] sm:$0xff]  ;;  %p1038_p10 = scmp.lt.s32.totalorder %s1436_s26, %s1036_s23  ;;  %p1039_p13 = scmp.lt.s32.totalorder %s1037_s30, %s1031_s28 }
  0x60   : > { %864 = vmatprep.mubr.bf16.mxu1 %v258_v10  ;;  %v227_v29 = vld [vmem:[%s1311_s9 + $0x48] sm:$0xff]  ;;  %v240_v30 = vld [vmem:[%s1311_s9 + $0xb0] sm:$0xff]  ;;  %v241_v31 = vld [vmem:[%s1311_s9 + $0xb8] sm:$0xff]  ;;  %v253_v34 = vpack.c.bf16 %v225_v27, %v224_v26  ;;  %p1034_p8 = pneg %p1033_p6 }
  0x61   : > { %v242_v32 = vld [vmem:[%s1311_s9 + $0xc0] sm:$0xff]  ;;  %v243_v33 = vld [vmem:[%s1311_s9 + $0xc8] sm:$0xff]  ;;  %v254_v35 = vpack.c.bf16 %v227_v29, %v226_v28  ;;  %v261_v36 = vpack.c.bf16 %v241_v31, %v240_v30  ;;  %v228_v38 = vld [vmem:[%s1311_s9 + $0x50] sm:$0xff]  ;;  %p1040_p3 = por %p1039_p13, %p1038_p10 }
  0x62   : > { %837 = vmatpush3.bf16.msra.mxu0 %v967_v2  ;;  %890 = vmatpush3.bf16.msra.mxu1 %v967_v2  ;;  %v262_v37 = vpack.c.bf16 %v243_v33, %v242_v32  ;;  %v229_v39 = vld [vmem:[%s1311_s9 + $0x58] sm:$0xff]  ;;  %v230_v40 = vld [vmem:[%s1311_s9 + $0x60] sm:$0xff]  ;;  %v231_v41 = vld [vmem:[%s1311_s9 + $0x68] sm:$0xff] }
  0x63   : > { %838 = vmatprep.subr.bf16.mxu0 %v968_v3  ;;  %883 = vmatprep.subr.bf16.mxu1 %v968_v3  ;;  %v244_v42 = vld [vmem:[%s1311_s9 + $0xd0] sm:$0xff]  ;;  %v245_v43 = vld [vmem:[%s1311_s9 + $0xd8] sm:$0xff]  ;;  %v246_v44 = vld [vmem:[%s1311_s9 + $0xe0] sm:$0xff]  ;;  %v255_v46 = vpack.c.bf16 %v229_v39, %v228_v38  ;;  %v256_v47 = vpack.c.bf16 %v231_v41, %v230_v40  ;;  %p1041_p7 = pnand %p1040_p3, %p1034_p8 }
  0x64   : > { %v247_v45 = vld [vmem:[%s1311_s9 + $0xe8] sm:$0xff]  ;;  %v263_v48 = vpack.c.bf16 %v245_v43, %v244_v42  ;;  %v232_v50 = vld [vmem:[%s1311_s9 + $0x70] sm:$0xff]  ;;  %v233_v51 = vld [vmem:[%s1311_s9 + $0x78] sm:$0xff] }
  0x65   : > { %v264_v49 = vpack.c.bf16 %v247_v45, %v246_v44  ;;  %v248_v52 = vld [vmem:[%s1311_s9 + $0xf0] sm:$0xff]  ;;  %v249_v53 = vld [vmem:[%s1311_s9 + $0xf8] sm:$0xff]  ;;  %v257_v54 = vpack.c.bf16 %v233_v51, %v232_v50 }
  0x66   : > { %839 = vmatpush3.bf16.msra.mxu0 %v968_v3  ;;  %891 = vmatpush3.bf16.msra.mxu1 %v968_v3  ;;  %v265_v55 = vpack.c.bf16 %v249_v53, %v248_v52 }
  0x67   : > { %840 = vmatprep.subr.bf16.mxu0 %v969_v7  ;;  %884 = vmatprep.subr.bf16.mxu1 %v969_v7 }
  0x6a   : > { %841 = vmatpush3.bf16.msra.mxu0 %v969_v7  ;;  %892 = vmatpush3.bf16.msra.mxu1 %v969_v7 }
  0x6b   : > { %842 = vmatprep.subr.bf16.mxu0 %v970_v11  ;;  %885 = vmatprep.subr.bf16.mxu1 %v970_v11 }
  0x6e   : > { %843 = vmatpush3.bf16.msra.mxu0 %v970_v11  ;;  %893 = vmatpush3.bf16.msra.mxu1 %v970_v11 }
  0x6f   : > { %844 = vmatprep.subr.bf16.mxu0 %v971_v12  ;;  %886 = vmatprep.subr.bf16.mxu1 %v971_v12 }
  0x72   : > { %845 = vmatpush3.bf16.msra.mxu0 %v971_v12  ;;  %894 = vmatpush3.bf16.msra.mxu1 %v971_v12 }
  0x73   : > { %846 = vmatprep.subr.bf16.mxu0 %v972_v13  ;;  %887 = vmatprep.subr.bf16.mxu1 %v972_v13 }
  0x76   : > { %847 = vmatpush3.bf16.msra.mxu0 %v972_v13  ;;  %895 = vmatpush3.bf16.msra.mxu1 %v972_v13 }
  0x79   : > { %849 = vmatmul.mubr.bf16.vlgmr.msra.gmra.mrb[0].mxu0 %v251_v22  ;;  %865 = vmatmul.mubr.bf16.vlgmr.msra.gmra.mrb[0].mxu1 %v259_v24 }
  0x7a   : > { %852 = vmatprep.mubr.bf16.mxu0 %v252_v23  ;;  %868 = vmatprep.mubr.bf16.mxu1 %v260_v25 }
  0x81   : > { %853 = vmatmul.mubr.bf16.gmra.mrb[4].mxu0 %v253_v34  ;;  %869 = vmatmul.mubr.bf16.gmra.mrb[4].mxu1 %v261_v36 }
  0x82   : > { %856 = vmatprep.mubr.bf16.mxu0 %v254_v35  ;;  %872 = vmatprep.mubr.bf16.mxu1 %v262_v37 }
  0x89   : > { %857 = vmatmul.mubr.bf16.gmra.mrb[8].mxu0 %v255_v46  ;;  %873 = vmatmul.mubr.bf16.gmra.mrb[8].mxu1 %v263_v48 }
  0x8a   : > { %860 = vmatprep.mubr.bf16.mxu0 %v256_v47  ;;  %876 = vmatprep.mubr.bf16.mxu1 %v264_v49 }
  0x91   : > { %861 = vmatmul.mubr.bf16.gmra.mrb[12].mxu0 %v257_v54  ;;  %877 = vmatmul.mubr.bf16.gmra.mrb[12].mxu1 %v265_v55 }
 0x14c   : > { %v850_v57 = vpop.f32.mrb[0].mxu0  ;;  %v1362_v59 = vpop.f32.mrb[0].mxu1 }
 0x14d   : > { %493 = vst [vmem:[%s1359_s4 + $0x10] sm:$0xff] %v850_v57  ;;  %v364_v58 = vpop.f32.mrb[1].mxu0  ;;  %509 = vst [vmem:[%s1359_s4 + $0x90] sm:$0xff] %v1362_v59  ;;  %v1367_v61 = vpop.f32.mrb[1].mxu1  ;;  %v563_v4 = vmul.f32 %v850_v57, %v850_v57 }
 0x14e   : > { %491 = vst [vmem:[%s1359_s4] sm:$0xff] %v364_v58  ;;  %v851_v60 = vpop.f32.mrb[2].mxu0  ;;  %507 = vst [vmem:[%s1359_s4 + $0x80] sm:$0xff] %v1367_v61  ;;  %v1372_v63 = vpop.f32.mrb[2].mxu1  ;;  %v561_v0 = vmul.f32 %v364_v58, %v364_v58 }
 0x14f   : > { %494 = vst [vmem:[%s1359_s4 + $0x18] sm:$0xff] %v851_v60  ;;  %v367_v62 = vpop.f32.mrb[3].mxu0  ;;  %510 = vst [vmem:[%s1359_s4 + $0x98] sm:$0xff] %v1372_v63  ;;  %v1377_v3 = vpop.f32.mrb[3].mxu1  ;;  %v564_v7 = vmul.f32 %v851_v60, %v851_v60 }
 0x150   : > { %492 = vst [vmem:[%s1359_s4 + $0x8] sm:$0xff] %v367_v62  ;;  %v523_v1 = vadd.f32 %v367_v62, %v364_v58  ;;  %v562_v2 = vmul.f32 %v367_v62, %v367_v62  ;;  %508 = vst [vmem:[%s1359_s4 + $0x88] sm:$0xff] %v1377_v3 }
 0x152   : > { %v524_v5 = vadd.f32 %v850_v57, %v523_v1  ;;  %v593_v6 = vadd.f32 %v562_v2, %v561_v0 }
 0x154   : > { %v594_v8 = vadd.f32 %v593_v6, %v563_v4  ;;  %v854_v9 = vpop.f32.mrb[4].mxu0  ;;  %v525_v10 = vadd.f32 %v851_v60, %v524_v5  ;;  %v1382_v12 = vpop.f32.mrb[4].mxu1 }
 0x155   : > { %497 = vst [vmem:[%s1359_s4 + $0x30] sm:$0xff] %v854_v9  ;;  %v380_v11 = vpop.f32.mrb[5].mxu0  ;;  %513 = vst [vmem:[%s1359_s4 + $0xb0] sm:$0xff] %v1382_v12  ;;  %v1387_v17 = vpop.f32.mrb[5].mxu1  ;;  %v567_v24 = vmul.f32 %v854_v9, %v854_v9 }
 0x156   : > { %495 = vst [vmem:[%s1359_s4 + $0x20] sm:$0xff] %v380_v11  ;;  %v526_v13 = vadd.f32 %v525_v10, %v380_v11  ;;  %v565_v14 = vmul.f32 %v380_v11, %v380_v11  ;;  %v595_v15 = vadd.f32 %v594_v8, %v564_v7  ;;  %v855_v16 = vpop.f32.mrb[6].mxu0  ;;  %511 = vst [vmem:[%s1359_s4 + $0xa0] sm:$0xff] %v1387_v17  ;;  %v1392_v19 = vpop.f32.mrb[6].mxu1 }
 0x157   : > { %498 = vst [vmem:[%s1359_s4 + $0x38] sm:$0xff] %v855_v16  ;;  %v383_v18 = vpop.f32.mrb[7].mxu0  ;;  %514 = vst [vmem:[%s1359_s4 + $0xb8] sm:$0xff] %v1392_v19  ;;  %v1397_v23 = vpop.f32.mrb[7].mxu1  ;;  %v568_v27 = vmul.f32 %v855_v16, %v855_v16 }
 0x158   : > { %v596_v20 = vadd.f32 %v595_v15, %v565_v14  ;;  %496 = vst [vmem:[%s1359_s4 + $0x28] sm:$0xff] %v383_v18  ;;  %v527_v21 = vadd.f32 %v526_v13, %v383_v18  ;;  %v566_v22 = vmul.f32 %v383_v18, %v383_v18  ;;  %512 = vst [vmem:[%s1359_s4 + $0xa8] sm:$0xff] %v1397_v23 }
 0x15a   : > { %v528_v25 = vadd.f32 %v854_v9, %v527_v21  ;;  %v597_v26 = vadd.f32 %v596_v20, %v566_v22 }
 0x15c   : > { %v598_v28 = vadd.f32 %v597_v26, %v567_v24  ;;  %v858_v29 = vpop.f32.mrb[8].mxu0  ;;  %v529_v30 = vadd.f32 %v855_v16, %v528_v25  ;;  %v1402_v32 = vpop.f32.mrb[8].mxu1 }
 0x15d   : > { %501 = vst [vmem:[%s1359_s4 + $0x50] sm:$0xff] %v858_v29  ;;  %v396_v31 = vpop.f32.mrb[9].mxu0  ;;  %517 = vst [vmem:[%s1359_s4 + $0xd0] sm:$0xff] %v1402_v32  ;;  %v1407_v37 = vpop.f32.mrb[9].mxu1  ;;  %v571_v44 = vmul.f32 %v858_v29, %v858_v29 }
 0x15e   : > { %499 = vst [vmem:[%s1359_s4 + $0x40] sm:$0xff] %v396_v31  ;;  %v530_v33 = vadd.f32 %v529_v30, %v396_v31  ;;  %v569_v34 = vmul.f32 %v396_v31, %v396_v31  ;;  %v599_v35 = vadd.f32 %v598_v28, %v568_v27  ;;  %v859_v36 = vpop.f32.mrb[10].mxu0  ;;  %515 = vst [vmem:[%s1359_s4 + $0xc0] sm:$0xff] %v1407_v37  ;;  %v1412_v39 = vpop.f32.mrb[10].mxu1 }
 0x15f   : > { %502 = vst [vmem:[%s1359_s4 + $0x58] sm:$0xff] %v859_v36  ;;  %v399_v38 = vpop.f32.mrb[11].mxu0  ;;  %518 = vst [vmem:[%s1359_s4 + $0xd8] sm:$0xff] %v1412_v39  ;;  %v1417_v43 = vpop.f32.mrb[11].mxu1  ;;  %v572_v47 = vmul.f32 %v859_v36, %v859_v36 }
 0x160   : > { %v600_v40 = vadd.f32 %v599_v35, %v569_v34  ;;  %500 = vst [vmem:[%s1359_s4 + $0x48] sm:$0xff] %v399_v38  ;;  %v531_v41 = vadd.f32 %v530_v33, %v399_v38  ;;  %v570_v42 = vmul.f32 %v399_v38, %v399_v38  ;;  %516 = vst [vmem:[%s1359_s4 + $0xc8] sm:$0xff] %v1417_v43 }
 0x162   : > { %v532_v45 = vadd.f32 %v858_v29, %v531_v41  ;;  %v601_v46 = vadd.f32 %v600_v40, %v570_v42 }
 0x164   : > { %v602_v48 = vadd.f32 %v601_v46, %v571_v44  ;;  %v862_v49 = vpop.f32.mrb[12].mxu0  ;;  %v533_v50 = vadd.f32 %v859_v36, %v532_v45  ;;  %v1424_v52 = vpop.f32.mrb[12].mxu1 }
 0x165   : > { %505 = vst [vmem:[%s1359_s4 + $0x70] sm:$0xff] %v862_v49  ;;  %v412_v51 = vpop.f32.mrb[13].mxu0  ;;  %521 = vst [vmem:[%s1359_s4 + $0xf0] sm:$0xff] %v1424_v52  ;;  %v1429_v57 = vpop.f32.mrb[13].mxu1  ;;  %v575_v4 = vmul.f32 %v862_v49, %v862_v49 }
 0x166   : > { %503 = vst [vmem:[%s1359_s4 + $0x60] sm:$0xff] %v412_v51  ;;  %v534_v53 = vadd.f32 %v533_v50, %v412_v51  ;;  %v573_v54 = vmul.f32 %v412_v51, %v412_v51  ;;  %v603_v55 = vadd.f32 %v602_v48, %v572_v47  ;;  %v863_v56 = vpop.f32.mrb[14].mxu0  ;;  %519 = vst [vmem:[%s1359_s4 + $0xe0] sm:$0xff] %v1429_v57  ;;  %v1441_v60 = vpop.f32.mrb[14].mxu1 }
 0x167   : > { %506 = vst [vmem:[%s1359_s4 + $0x78] sm:$0xff] %v863_v56  ;;  %v415_v58 = vpop.f32.mrb[15].mxu0  ;;  %522 = vst [vmem:[%s1359_s4 + $0xf8] sm:$0xff] %v1441_v60  ;;  %v1446_v2 = vpop.f32.mrb[15].mxu1 }
 0x168   : > { %v604_v62 = vadd.f32 %v603_v55, %v573_v54  ;;  %504 = vst [vmem:[%s1359_s4 + $0x68] sm:$0xff] %v415_v58  ;;  %v535_v0 = vadd.f32 %v534_v53, %v415_v58  ;;  %v574_v1 = vmul.f32 %v415_v58, %v415_v58  ;;  %520 = vst [vmem:[%s1359_s4 + $0xe8] sm:$0xff] %v1446_v2 }
 0x16a   : > { %v536_v5 = vadd.f32 %v862_v49, %v535_v0  ;;  %v605_v6 = vadd.f32 %v604_v62, %v574_v1 }
 0x16b   : > { %1044 = shalt.err (!%p1041_p7)
}
 0x16c   : > { %s1045_s22 = scalar_lea.hbm %s1434_s11, 4096  ;;  %s1049_s9 = scalar_lea.hbm %s1575_s2, 8192 }
 0x16d   : > { %p1046_p9 = scmp.ne.s32.totalorder %s1434_s11, %s1045_s22  ;;  %p1050_p5 = scmp.lt.u32.totalorder %s1434_s11, %s1575_s2 }
 0x16e   : > { %p1051_p11 = scmp.lt.u32.totalorder %s1049_s9, %s1045_s22  ;;  %p1053_p4 = scmp.lt.u32.totalorder %s1045_s22, %s1434_s11 }
 0x16f   : > { %p1047_p2 = pnand %p1046_p9, %p1257_p12 }
 0x170   : > { %p1052_p1 = por %p1051_p11, %p1050_p5 }
 0x171   : > { %p1048_p0 = pneg %p1047_p2 }
 0x172   : > { %p1054_p6 = por %p1053_p4, %p1052_p1 }
 0x174   : > { %p1055_p8 = pnand %p1054_p6, %p1048_p0 }
 0x176   : > { %1058 = shalt.err (!%p1055_p8)
}
 0x177   : > { %s1143_s25 = smov 128   ;;  %s1144_s5 = smov 8   ;;  %v576_v7 = vmul.f32 %v863_v56, %v863_v56  ;;  %v606_v8 = vadd.f32 %v605_v6, %v575_v4  ;;  %v537_v9 = vadd.f32 %v863_v56, %v536_v5  ;;  %v577_v10 = vmul.f32 %v1367_v61, %v1367_v61 }
 0x178   : > { %902 = dma.vmem_to_hbm [thread:$0]  (%p1257_p12), %s1436_s26, 4096, %s1434_s11, %s633_s27, %s1143_s25, %s1143_s25, %s1144_s5   ;;  %v578_v16 = vmul.f32 %v1377_v3, %v1377_v3  ;;  %v579_v18 = vmul.f32 %v1362_v59, %v1362_v59  ;;  %v580_v22 = vmul.f32 %v1372_v63, %v1372_v63  ;;  %v582_v29 = vmul.f32 %v1397_v23, %v1397_v23 }
 0x179   : > { %v538_v11 = vadd.f32 %v537_v9, %v1367_v61  ;;  %v607_v13 = vadd.f32 %v606_v8, %v576_v7  ;;  %v581_v61 = vmul.f32 %v1387_v17, %v1387_v17  ;;  %v586_v40 = vmul.f32 %v1417_v43, %v1417_v43  ;;  %s803_s26 = sshll.u32 %s1187_s16, 7  ;;  %s667_s10 = sshll.u32 %s1354_s20, 4  ;;  %s1530_s10 = int_to_ptr.vmem [resolvable:$true] %s667_s10 }
 0x17a   : > { %v590_v49 = vmul.f32 %v1446_v2, %v1446_v2  ;;  %v592_v51 = vmul.f32 %v1441_v60, %v1441_v60  ;;  %s1528_s28 = scalar_lea.hbm %s1576_s3, %s803_s26  ;;  %s638_s29 = scalar_lea.sflag [#allocation9], %s1305_s6 }
 0x17b   : > { %v608_v14 = vadd.f32 %v607_v13, %v577_v10  ;;  %v539_v15 = vadd.f32 %v538_v11, %v1377_v3  ;;  %s1059_s23 = scalar_lea.vmem %s1530_s10, 128  ;;  %s1145_s16 = smov [#allocation8]  }
 0x17c   : > { %p1060_p10 = scmp.ne.s32.totalorder %s1530_s10, %s1059_s23  ;;  %s1063_s30 = sshll.u32 %s1145_s16, 4  ;;  %s1064_s30 = int_to_ptr.vmem [resolvable:$false] %s1063_s30 }
 0x17d   : > { %v540_v20 = vadd.f32 %v1362_v59, %v539_v15  ;;  %v609_v21 = vadd.f32 %v608_v14, %v578_v16  ;;  %v583_v59 = vmul.f32 %v1382_v12, %v1382_v12  ;;  %s1065_s22 = scalar_lea.vmem %s1064_s30, 256  ;;  %p1066_p7 = scmp.lt.s32.totalorder %s1530_s10, %s1064_s30 }
 0x17e   : > { %p1061_p13 = pnand %p1060_p10, %p1257_p12  ;;  %p1067_p9 = scmp.lt.s32.totalorder %s1065_s22, %s1059_s23 }
 0x17f   : > { %v610_v24 = vadd.f32 %v609_v21, %v579_v18  ;;  %v541_v25 = vadd.f32 %v1372_v63, %v540_v20  ;;  %v584_v63 = vmul.f32 %v1392_v19, %v1392_v19 }
 0x180   : > { %p1062_p3 = pneg %p1061_p13  ;;  %p1068_p2 = por %p1067_p9, %p1066_p7 }
 0x181   : > { %v542_v26 = vadd.f32 %v541_v25, %v1387_v17  ;;  %v611_v27 = vadd.f32 %v610_v24, %v580_v22  ;;  %v585_v17 = vmul.f32 %v1407_v37, %v1407_v37 }
 0x182   : > { %p1069_p0 = pnand %p1068_p2, %p1062_p3 }
 0x183   : > { %v612_v28 = vadd.f32 %v611_v27, %v581_v61  ;;  %v543_v3 = vadd.f32 %v542_v26, %v1397_v23 }
 0x185   : > { %v544_v30 = vadd.f32 %v1382_v12, %v543_v3  ;;  %v613_v31 = vadd.f32 %v612_v28, %v582_v29  ;;  %v587_v12 = vmul.f32 %v1402_v32, %v1402_v32 }
 0x187   : > { %v614_v33 = vadd.f32 %v613_v31, %v583_v59  ;;  %v545_v34 = vadd.f32 %v1392_v19, %v544_v30  ;;  %v588_v19 = vmul.f32 %v1412_v39, %v1412_v39 }
 0x189   : > { %v546_v35 = vadd.f32 %v545_v34, %v1407_v37  ;;  %v615_v36 = vadd.f32 %v614_v33, %v584_v63  ;;  %v589_v37 = vmul.f32 %v1429_v57, %v1429_v57 }
 0x18b   : > { %v616_v38 = vadd.f32 %v615_v36, %v585_v17  ;;  %v547_v23 = vadd.f32 %v546_v35, %v1417_v43 }
 0x18d   : > { %v548_v41 = vadd.f32 %v1402_v32, %v547_v23  ;;  %v617_v42 = vadd.f32 %v616_v38, %v586_v40  ;;  %v591_v32 = vmul.f32 %v1424_v52, %v1424_v52 }
 0x18f   : > { %v618_v44 = vadd.f32 %v617_v42, %v587_v12  ;;  %v549_v45 = vadd.f32 %v1412_v39, %v548_v41 }
 0x191   : > { %v550_v46 = vadd.f32 %v549_v45, %v1429_v57  ;;  %v619_v47 = vadd.f32 %v618_v44, %v588_v19 }
 0x193   : > { %v620_v48 = vadd.f32 %v619_v47, %v589_v37  ;;  %v551_v43 = vadd.f32 %v550_v46, %v1446_v2 }
 0x195   : > { %v552_v50 = vadd.f32 %v1424_v52, %v551_v43  ;;  %v621_v39 = vadd.f32 %v620_v48, %v590_v49 }
 0x197   : > { %v553_v53 = vadd.f32 %v1441_v60, %v552_v50  ;;  %v622_v54 = vadd.f32 %v621_v39, %v591_v32 }
 0x199   : > { %v554_v55 = vrot.slane %v553_v53, 4  ;;  %v623_v56 = vadd.f32 %v622_v54, %v592_v51 }
 0x19b   : > { %v555_v57 = vadd.f32 %v554_v55, %v553_v53  ;;  %v624_v58 = vrot.slane %v623_v56, 4 }
 0x19d   : > { %v556_v62 = vrot.slane %v555_v57, 2  ;;  %v625_v0 = vadd.f32 %v624_v58, %v623_v56 }
 0x19f   : > { %v557_v1 = vadd.f32 %v556_v62, %v555_v57  ;;  %v626_v52 = vrot.slane %v625_v0, 2 }
 0x1a1   : > { %v558_v2 = vrot.slane %v557_v1, 1  ;;  %v627_v4 = vadd.f32 %v626_v52, %v625_v0 }
 0x1a3   : > { %v559_v5 = vadd.f32 %v558_v2, %v557_v1  ;;  %v628_v6 = vrot.slane %v627_v4, 1 }
 0x1a5   : > { %v629_v60 = vadd.f32 %v628_v6, %v627_v4  ;;  %560 = vst [vmem:[%s1354_s20] sm:$0x1] %v559_v5 }
 0x1a7   : > { %630 = vst [vmem:[%s1354_s20 + $0x1] sm:$0x1] %v629_v60 }
 0x1a8   : > { %1072 = shalt.err (!%p1069_p0)
}
 0x1a9   : > { %s1073_s6 = scalar_lea.hbm %s1528_s28, 128  ;;  %s1077_s8 = scalar_lea.hbm %s1576_s3, 256 }
 0x1aa   : > { %p1074_p5 = scmp.ne.s32.totalorder %s1528_s28, %s1073_s6  ;;  %p1078_p4 = scmp.lt.u32.totalorder %s1528_s28, %s1576_s3 }
 0x1ab   : > { %p1079_p6 = scmp.lt.u32.totalorder %s1077_s8, %s1073_s6  ;;  %p1081_p10 = scmp.lt.u32.totalorder %s1073_s6, %s1528_s28 }
 0x1ac   : > { %p1075_p11 = pnand %p1074_p5, %p1257_p12 }
 0x1ad   : > { %p1080_p8 = por %p1079_p6, %p1078_p4 }
 0x1ae   : > { %p1076_p1 = pneg %p1075_p11 }
 0x1af   : > { %p1082_p13 = por %p1081_p10, %p1080_p8 }
 0x1b1   : > { %p1083_p3 = pnand %p1082_p13, %p1076_p1 }
 0x1b3   : > { %1086 = shalt.err (!%p1083_p3)
}
 0x1b4   : > { %903 = dma.vmem_to_hbm [thread:$0]  (%p1257_p12), %s1530_s10, 128, %s1528_s28, %s638_s29  }
 0x1b5 PF: > { %s679_s4 = sand.u32 1, %s1121_s12   ;;  %p1591_p7 = scmp.ne.s32.totalorder %s1581_s19, 0 }
 0x1b6   : > { %p1592_p9 = scmp.ge.s32.totalorder %s1133_s15, 2  ;;  %s680_s25 = scalar_lea.sflag [#allocation4], %s679_s4 }
 0x1b8   : > { %p915_p2 = pnand %p1592_p9, %p1591_p7 }
 0x1ba   : > { %1112 = dma.done.wait (!%p915_p2), %s680_s25, 4096  }
 0x1bb   : > { %1114 = vsyncadd (!%p915_p2), %s680_s25, 4294963200  ;;  %s689_s5 = scalar_lea.sflag [#allocation9], %s679_s4 }
 0x1bc   : > { %1116 = dma.done.wait (!%p915_p2), %s689_s5, 128  }
 0x1bd   : > { %1118 = vsyncadd (!%p915_p2), %s689_s5, 4294967168  ;;  %p21_p12 = scmp.ge.s32.totalorder %s1222_s24, 4   ;;  %s1593_s12 = smov %s1125_s13 }
 0x1be   : > { %s1594_s13 = smov %s1129_s14  ;;  %s1595_s14 = smov %s1253_s17 }
 0x1bf   : > { %s1596_s15 = smov %s1222_s24  ;;  %23 = sbr.rel (!%p21_p12) target bundleno = 8 (0x8), region = 94 }
 0x1c6   :  { %694 = vsyncpa [#allocation3], 1 }
 0x1c7   :  { %696 = vsyncpa [#allocation3 + $0x1], 1 }
 0x1c8   :  { %697 = vsyncpa [#allocation6], 1 }
 0x1c9   :  { %698 = vsyncpa [#allocation4], 1 }
 0x1ca   :  { %700 = vsyncpa [#allocation4 + $0x1], 1 }
 0x1cb   :  { %701 = vsyncpa [#allocation9], 1 }
 0x1cc   :  { %703 = vsyncpa [#allocation9 + $0x1], 1 }

</bundles_post_ra>
